<compile_context>
chip_gen: v5e
topology: v5e:2x2
jax: 0.10.0
libtpu: 0.0.40
codegen_flags: <defaults>
</compile_context>

<pallas_src>
import numpy as np
import jax
import jax.numpy as jnp
from jax.experimental import pallas as pl
from jax.experimental.pallas import tpu as pltpu


def _embed_nd_kernel(ids_ref, sel_ref, rc_ref, rs_ref, out_ref):
    # ids_ref: (1, TS, A) f32 ; sel_ref: (A, Dh) f32
    # rc_ref/rs_ref: (Dh, 4*Dh) f32 constant 0/+-1 interleave-expansion matrices
    # out_ref: (1, TS, 4*Dh) f32
    ids = ids_ref[0]            # (TS, A)
    sel = sel_ref[...]          # (A, Dh)
    n_axes = sel.shape[0]

    # angles[s, d] = sum_i ids[s, i] * sel[i, d] -- A broadcast FMAs on the VPU
    # (sel already encodes the axis -> frequency-range concat; rows are zero
    # outside their own range, so the sum is exact per column).
    angles = ids[:, 0:1] * sel[0:1, :]
    for i in range(1, n_axes):
        angles = angles + ids[:, i:i + 1] * sel[i:i + 1, :]

    c = jnp.cos(angles)         # (TS, Dh)
    s = jnp.sin(angles)         # (TS, Dh)

    # Interleave into the lane-dense final layout:
    #   out[s, 4*d+0] = c, 4*d+1 = -s, 4*d+2 = s, 4*d+3 = c
    out = (jnp.dot(c, rc_ref[...], preferred_element_type=jnp.float32)
           + jnp.dot(s, rs_ref[...], preferred_element_type=jnp.float32))
    out_ref[0] = out


def _pick_seq_tile(S):
    if S % 8 != 0:
        return S                # block == full dim -> always a legal block
    for ts in (1024, 512, 256, 128, 64, 32, 16, 8):
        if ts <= S and S % ts == 0:
            return ts
    return S


def embed_nd(ids, axes_dim, theta):
    """ids: (B, S, A) int/float array. Returns (B, 1, S, Dh, 2, 2) float32."""
    B, S, A = ids.shape
    assert A == len(axes_dim)
    Dh = sum(d // 2 for d in axes_dim)

    # (A, Dh) omega/selection matrix, built on host in float64 (mirrors the
    # torch float64 omega computation), then cast to f32 for the kernel.
    # TODO(synk): kernel cos/sin run in f32 (torch computes them in f64 then casts).
    sel_np = np.zeros((A, Dh), dtype=np.float64)
    off = 0
    for i, d in enumerate(axes_dim):
        assert d % 2 == 0, "The dimension must be even."
        half = d // 2
        scale = np.arange(0, d, 2, dtype=np.float64) / d
        sel_np[i, off:off + half] = 1.0 / (float(theta) ** scale)
        off += half
    sel = jnp.asarray(sel_np, dtype=jnp.float32)

    # Constant 0/+-1 expansion matrices mapping compact (Dh,) cos/sin rows onto
    # the interleaved (4*Dh,) output layout.
    rc_np = np.zeros((Dh, 4 * Dh), dtype=np.float32)
    rs_np = np.zeros((Dh, 4 * Dh), dtype=np.float32)
    for d in range(Dh):
        rc_np[d, 4 * d + 0] = 1.0
        rc_np[d, 4 * d + 3] = 1.0
        rs_np[d, 4 * d + 1] = -1.0
        rs_np[d, 4 * d + 2] = 1.0
    rc = jnp.asarray(rc_np)
    rs = jnp.asarray(rs_np)

    # Note: integer ids are exact in f32 only for |id| < 2**24 (fine for RoPE positions).
    ids_f32 = ids.astype(jnp.float32)

    TS = _pick_seq_tile(S)
    grid = (B, S // TS)

    out = pl.pallas_call(
        _embed_nd_kernel,
        out_shape=jax.ShapeDtypeStruct((B, S, 4 * Dh), jnp.float32),
        grid_spec=pltpu.PrefetchScalarGridSpec(
            num_scalar_prefetch=0,
            grid=grid,
            in_specs=[
                pl.BlockSpec((1, TS, A), lambda b, t: (b, t, 0)),
                pl.BlockSpec((A, Dh), lambda b, t: (0, 0)),
                pl.BlockSpec((Dh, 4 * Dh), lambda b, t: (0, 0)),
                pl.BlockSpec((Dh, 4 * Dh), lambda b, t: (0, 0)),
            ],
            out_specs=pl.BlockSpec((1, TS, 4 * Dh), lambda b, t: (b, t, 0)),
        ),
        compiler_params=pltpu.CompilerParams(
            dimension_semantics=("parallel", "parallel")),
    )(ids_f32, sel, rc, rs)

    # Pure-metadata reshape into the PyTorch layout (no transpose, no extra
    # HBM round trip): (B, S, 4*Dh) -> (B, 1, S, Dh, 2, 2)
    return out.reshape(B, S, Dh, 2, 2)[:, None]


def _reference(ids, axes_dim, theta):
    # Pure-JAX reference mirroring the PyTorch module (f32 throughout).
    parts = []
    B = ids.shape[0]
    for i, d in enumerate(axes_dim):
        pos = ids[..., i].astype(jnp.float32)
        scale = jnp.arange(0, d, 2, dtype=jnp.float32) / d
        omega = 1.0 / (theta ** scale)
        out = pos[..., None] * omega                      # (B, S, d//2)
        c, s = jnp.cos(out), jnp.sin(out)
        stacked = jnp.stack([c, -s, s, c], axis=-1)       # (B, S, d//2, 4)
        parts.append(stacked.reshape(B, -1, d // 2, 2, 2))
    emb = jnp.concatenate(parts, axis=-3)
    return emb[:, None]


if __name__ == "__main__":
    B, S = 2, 8
    axes_dim = [16, 8, 8]   # sum(axes_dim) == dim == 32
    theta = 10000
    A = len(axes_dim)
    Dh = sum(d // 2 for d in axes_dim)

    key = jax.random.PRNGKey(0)
    ids = jax.random.randint(key, (B, S, A), 0, 64, dtype=jnp.int32)

    out = embed_nd(ids, axes_dim, theta)
    out = jax.block_until_ready(out)

    assert out.shape == (B, 1, S, Dh, 2, 2)
    ref = _reference(ids, axes_dim, theta)
    np.testing.assert_allclose(np.asarray(out), np.asarray(ref), rtol=1e-5, atol=1e-5)
    print("KERNEL_OK")
</pallas_src>

<mosaic_0001>
module attributes {stable_mosaic.version = 11 : i64} {
  func.func @_embed_nd_kernel(%arg0: i32, %arg1: i32, %arg2: memref<1x8x3xf32, #tpu.memory_space<vmem>>, %arg3: memref<3x16xf32, #tpu.memory_space<vmem>>, %arg4: memref<16x64xf32, #tpu.memory_space<vmem>>, %arg5: memref<16x64xf32, #tpu.memory_space<vmem>>, %arg6: memref<1x8x64xf32, #tpu.memory_space<vmem>>) attributes {dimension_semantics = [#tpu.dimension_semantics<parallel>, #tpu.dimension_semantics<parallel>], iteration_bounds = array<i64: 2, 1>, scalar_prefetch = 0 : i64, scratch_operands = 0 : i64, tpu.core_type = #tpu.core_type<tc>, window_params = [{transform_indices = @transform_0, window_bounds = array<i64: 1, 8, 3>}, {pipeline_mode = #tpu.pipeline_mode<synchronous>, transform_indices = @transform_1, window_bounds = array<i64: 3, 16>}, {pipeline_mode = #tpu.pipeline_mode<synchronous>, transform_indices = @transform_2, window_bounds = array<i64: 16, 64>}, {pipeline_mode = #tpu.pipeline_mode<synchronous>, transform_indices = @transform_3, window_bounds = array<i64: 16, 64>}, {transform_indices = @transform_4, window_bounds = array<i64: 1, 8, 64>}]} {
    %c0 = arith.constant 0 : index
    %c0_0 = arith.constant 0 : index
    %c0_1 = arith.constant 0 : index
    %0 = vector.load %arg2[%c0, %c0_0, %c0_1] : memref<1x8x3xf32, #tpu.memory_space<vmem>>, vector<1x8x3xf32>
    %1 = vector.shape_cast %0 : vector<1x8x3xf32> to vector<8x3xf32>
    %c0_2 = arith.constant 0 : index
    %c0_3 = arith.constant 0 : index
    %2 = vector.load %arg3[%c0_2, %c0_3] : memref<3x16xf32, #tpu.memory_space<vmem>>, vector<3x16xf32>
    %3 = vector.extract_strided_slice %1 {offsets = [0, 0], sizes = [8, 1], strides = [1, 1]} : vector<8x3xf32> to vector<8x1xf32>
    %4 = vector.extract_strided_slice %2 {offsets = [0, 0], sizes = [1, 16], strides = [1, 1]} : vector<3x16xf32> to vector<1x16xf32>
    %5 = vector.broadcast %3 : vector<8x1xf32> to vector<8x16xf32>
    %6 = vector.broadcast %4 : vector<1x16xf32> to vector<8x16xf32>
    %7 = arith.mulf %5, %6 : vector<8x16xf32>
    %8 = vector.extract_strided_slice %1 {offsets = [0, 1], sizes = [8, 1], strides = [1, 1]} : vector<8x3xf32> to vector<8x1xf32>
    %9 = vector.extract_strided_slice %2 {offsets = [1, 0], sizes = [1, 16], strides = [1, 1]} : vector<3x16xf32> to vector<1x16xf32>
    %10 = vector.broadcast %8 : vector<8x1xf32> to vector<8x16xf32>
    %11 = vector.broadcast %9 : vector<1x16xf32> to vector<8x16xf32>
    %12 = arith.mulf %10, %11 : vector<8x16xf32>
    %13 = arith.addf %7, %12 : vector<8x16xf32>
    %14 = vector.extract_strided_slice %1 {offsets = [0, 2], sizes = [8, 1], strides = [1, 1]} : vector<8x3xf32> to vector<8x1xf32>
    %15 = vector.extract_strided_slice %2 {offsets = [2, 0], sizes = [1, 16], strides = [1, 1]} : vector<3x16xf32> to vector<1x16xf32>
    %16 = vector.broadcast %14 : vector<8x1xf32> to vector<8x16xf32>
    %17 = vector.broadcast %15 : vector<1x16xf32> to vector<8x16xf32>
    %18 = arith.mulf %16, %17 : vector<8x16xf32>
    %19 = arith.addf %13, %18 : vector<8x16xf32>
    %20 = math.cos %19 : vector<8x16xf32>
    %21 = math.sin %19 : vector<8x16xf32>
    %c0_4 = arith.constant 0 : index
    %c0_5 = arith.constant 0 : index
    %22 = vector.load %arg4[%c0_4, %c0_5] : memref<16x64xf32, #tpu.memory_space<vmem>>, vector<16x64xf32>
    %cst = arith.constant dense<0.000000e+00> : vector<8x64xf32>
    %23 = tpu.matmul %20, %22, %cst {dimension_numbers = #tpu.dot_dimension_numbers<[1], [0], [0], [1], [0, 0, 1, 1], [], []>} : vector<8x16xf32>, vector<16x64xf32>, vector<8x64xf32> -> vector<8x64xf32>
    %c0_6 = arith.constant 0 : index
    %c0_7 = arith.constant 0 : index
    %24 = vector.load %arg5[%c0_6, %c0_7] : memref<16x64xf32, #tpu.memory_space<vmem>>, vector<16x64xf32>
    %cst_8 = arith.constant dense<0.000000e+00> : vector<8x64xf32>
    %25 = tpu.matmul %21, %24, %cst_8 {dimension_numbers = #tpu.dot_dimension_numbers<[1], [0], [0], [1], [0, 0, 1, 1], [], []>} : vector<8x16xf32>, vector<16x64xf32>, vector<8x64xf32> -> vector<8x64xf32>
    %26 = arith.addf %23, %25 : vector<8x64xf32>
    %c0_9 = arith.constant 0 : index
    %c0_10 = arith.constant 0 : index
    %c0_11 = arith.constant 0 : index
    %27 = vector.load %arg6[%c0_9, %c0_10, %c0_11] : memref<1x8x64xf32, #tpu.memory_space<vmem>>, vector<1x8x64xf32>
    %28 = vector.shape_cast %27 : vector<1x8x64xf32> to vector<8x64xf32>
    %29 = vector.shape_cast %26 : vector<8x64xf32> to vector<1x8x64xf32>
    tpu.vector_store %arg6[%c0_9, %c0_10, %c0_11], %29 {strides = array<i32>} : memref<1x8x64xf32, #tpu.memory_space<vmem>>, vector<1x8x64xf32>,
    return
  }
  func.func @transform_0(%arg0: i32, %arg1: i32) -> (i32, i32, i32) {
    %c0_i32 = arith.constant 0 : i32
    %c0_i32_0 = arith.constant 0 : i32
    return %arg0, %arg1, %c0_i32 : i32, i32, i32
  }
  func.func @transform_1(%arg0: i32, %arg1: i32) -> (i32, i32) {
    %c0_i32 = arith.constant 0 : i32
    %c0_i32_0 = arith.constant 0 : i32
    %c0_i32_1 = arith.constant 0 : i32
    return %c0_i32, %c0_i32_0 : i32, i32
  }
  func.func @transform_2(%arg0: i32, %arg1: i32) -> (i32, i32) {
    %c0_i32 = arith.constant 0 : i32
    %c0_i32_0 = arith.constant 0 : i32
    %c0_i32_1 = arith.constant 0 : i32
    return %c0_i32, %c0_i32_0 : i32, i32
  }
  func.func @transform_3(%arg0: i32, %arg1: i32) -> (i32, i32) {
    %c0_i32 = arith.constant 0 : i32
    %c0_i32_0 = arith.constant 0 : i32
    %c0_i32_1 = arith.constant 0 : i32
    return %c0_i32, %c0_i32_0 : i32, i32
  }
  func.func @transform_4(%arg0: i32, %arg1: i32) -> (i32, i32, i32) {
    %c0_i32 = arith.constant 0 : i32
    %c0_i32_0 = arith.constant 0 : i32
    return %arg0, %arg1, %c0_i32 : i32, i32, i32
  }
}

</mosaic_0001>

<bundles_post_ra>
// kernel: tpu_custom_call.1
= control target key start
LH: loop header
LB: loop body
LE: loop exit
PB: predicated region body
PF: predicated region fallthrough
CT: control target
= control target key end

     0   :  { %9 = vsyncpa [#allocation3], 0  ;;  %s1141_s0 = inlined_call_operand.vmem [shape: f32[2,8,3], index: 0, kind: input, shape index: {}]   ;;  %s1142_s1 = inlined_call_operand.vmem [shape: f32[3,16], index: 1, kind: input, shape index: {}]   ;;  %s1143_s2 = inlined_call_operand.vmem [shape: f32[16,64], index: 2, kind: input, shape index: {}]   ;;  %s1144_s3 = inlined_call_operand.hbm [shape: f32[16,64], index: 3, kind: input, shape index: {}]   ;;  %s1145_s4 = inlined_call_operand.hbm [shape: f32[2,8,64], index: 4, kind: output, shape index: {}]  }
   0x1   :  { %10 = vsyncpa [#allocation4], 0 }
   0x2   :  { %12 = vsyncpa [#allocation4 + $0x1], 0  ;;  %s973_s15 = smov 0   ;;  %s975_s16 = smov 0  }
   0x3   :  { %s977_s17 = smov 0   ;;  %s979_s18 = smov 0  }
   0x4   :  { %s981_s19 = smov 0   ;;  %s983_s20 = smov 0  }
   0x5 LB: > { %s720_s21 = sadd.s32 4294967295, %s934_s20   ;;  %s721_s22 = sadd.s32 4294967294, %s934_s20   ;;  %s934_s20 = sphi %s983_s20, %s18_s20   ;;  %s930_s19 = sphi %s981_s19, %s1152_s19   ;;  %s926_s18 = sphi %s979_s18, %s1151_s18   ;;  %s922_s17 = sphi %s977_s17, %s1150_s17   ;;  %s918_s16 = sphi %s975_s16, %s1149_s16   ;;  %s914_s15 = sphi %s973_s15, %s1148_s15  }
   0x6   : > { %s30_s23 = sadd.s32 1, %s930_s19  ;;  %s130_s24 = sadd.s32 1, %s922_s17 }
   0x7   : > { %p32_p0 = scmp.ge.s32.totalorder %s30_s23, 2  ;;  %p140_p1 = scmp.ne.s32.totalorder %s922_s17, %s918_s16 }
   0x8   : > { %p141_p2 = scmp.eq.s32.totalorder %s720_s21, 1  ;;  %p146_p3 = scmp.ne.s32.totalorder %s918_s16, %s914_s15 }
   0x9   : > { %s1154_s23 = smov (%p32_p0, %s30_s23), 0  ;;  %p147_p5 = scmp.eq.s32.totalorder %s721_s22, 1 }
   0xa   : > { %p1013_p4 = por %p141_p2, %p140_p1  ;;  %s125_s26 = ssub.s32 %s930_s19, %s1154_s23 }
   0xb   : > { %p722_p6 = scmp.ge.s32.totalorder %s934_s20, 1  ;;  %p128_p7 = scmp.eq.s32.totalorder %s125_s26, 0 }
   0xc   : > { %p1020_p8 = por %p147_p5, %p146_p3  ;;  %p154_p9 = scmp.lt.s32.totalorder %s934_s20, 3 }
   0xd   : > { %s1026_s28 = scalar_select %p128_p7, %s922_s17, %s130_s24  }
   0xe   : > { %p155_p10 = pnand %p722_p6, %p154_p9  ;;  %p755_p11 = scmp.eq.s32.totalorder %s720_s21, 0 }
   0xf   : > { %s171_s5 = sshll.u32 %s1144_s3, 4  ;;  %s936_s6 = smov [#allocation2]   ;;  %s172_s5 = int_to_ptr.hbm [resolvable:$true] %s171_s5 }
  0x10   : > { %p747_p12 = pneg %p155_p10  ;;  %s173_s7 = sshll.u32 %s936_s6, 4  ;;  %s174_s7 = int_to_ptr.vmem [resolvable:$true] %s173_s7 }
  0x11   : > { %s937_s8 = smov 128   ;;  %s938_s9 = smov 8  }
  0x12   : > { %p748_p13 = pnand %p755_p11, %p747_p12  ;;  %199 = sbr.rel (%p155_p10) target bundleno = 388 (0x184), region = 36 }
  0x14   : > { %750 = dma.hbm_to_vmem [thread:$0]  (!%p748_p13), %s172_s5, 256, %s174_s7, [#allocation3], %s937_s8, %s937_s8, %s938_s9  }
  0x17   : > { %905 = dma.done.wait (%p755_p11), [#allocation3], 256  }
  0x18   : > { %907 = vsyncadd (%p755_p11), [#allocation3], 4294967040  ;;  %p228_p0 = scmp.lt.s32.totalorder %s926_s18, 1  ;;  %v939_v0 = vmov 0   ;;  %v940_v1 = vmov 2   ;;  %v941_v3 = vmov 1  }
  0x19   : > { %818 = vset.pattern.permute.xlu0 %v939_v0  ;;  %820 = vset.pattern.permute.xlu1 %v940_v1  ;;  %v570_v5 = vld [vmem:[#allocation2 + $0x8] sm:$0xff]  ;;  %v569_v7 = vld [vmem:[#allocation2] sm:$0xff]  ;;  %v942_v31 = vmov 2102212464   ;;  %v943_v33 = vmov 920167782  }
  0x1a   : > { %s229_s10 = scalar_select %p228_p0, %s926_s18, 1  ;;  %v568_v6 = vld [vmem:[%s1143_s2 + $0x8] sm:$0xff]  ;;  %v236_v8 = vld [vmem:[%s1142_s1] sm:$0x7]  ;;  %589 = vmatpush.msra.mxu0 %v570_v5  ;;  %v944_v36 = vmov 1326507024  }
  0x1b   : > { %612 = vmatpush.msra.mxu1 %v568_v6  ;;  %v567_v9 = vld [vmem:[%s1143_s2] sm:$0xff]  ;;  %v242_v10 = vperm.slane %v236_v8, 0  ;;  %v248_v11 = vperm.slane %v236_v8, 1  ;;  %v255_v12 = vperm.slane %v236_v8, 2  ;;  %v945_v38 = vmov 683565275  }
  0x1c   : > { %s728_s11 = sshll.u32 %s229_s10, 3  ;;  %590 = vmatpush.msra.mxu0 %v569_v7  ;;  %v946_v40 = vmov 2475754826   ;;  %v947_v43 = vmov 2131351028   ;;  %s225_s5 = sand.u32 1, %s918_s16  }
  0x1d   : > { %s234_s14 = scalar_lea.vmem %s1141_s0, %s728_s11  ;;  %613 = vmatpush.msra.mxu1 %v567_v9  ;;  %s727_s6 = sshll.u32 %s225_s5, 3 }
  0x1e   : > { %v235_v2 = vld [vmem:[%s234_s14] sm:$0xff]  ;;  %s738_s7 = sshll.u32 %s926_s18, 3  ;;  %s227_s11 = scalar_lea.vmem [#allocation5], %s727_s6 }
  0x1f   : > { %239 = vperm.xlu0 %818, %v235_v2   ;;  %252 = vperm.xlu1 %820, %v235_v2   ;;  %s632_s10 = scalar_lea.hbm %s1145_s4, %s738_s7  ;;  %s634_s12 = sshll.u32 %s227_s11, 4  ;;  %s635_s12 = int_to_ptr.vmem [resolvable:$true] %s634_s12 }
  0x20   : > { %s636_s13 = sshll.u32 %s632_s10, 4  ;;  %s621_s14 = scalar_lea.sflag [#allocation4], %s225_s5  ;;  %s637_s13 = int_to_ptr.hbm [resolvable:$true] %s636_s13 }
  0x21   : > { %s866_s21 = sshra.s32 %s637_s13, 4  ;;  %s872_s26 = scalar_lea.hbm %s1145_s4, 16  ;;  %s867_s21 = int_to_ptr.hbm [resolvable:$true] %s866_s21 }
  0x22   : > { %s868_s22 = scalar_lea.hbm %s867_s21, 8  ;;  %p873_p5 = scmp.lt.s32.totalorder %s867_s21, %s1145_s4 }
  0x23   : > { %p869_p1 = scmp.ne.s32.totalorder %s867_s21, %s868_s22  ;;  %p874_p6 = scmp.lt.s32.totalorder %s872_s26, %s868_s22 }
  0x25   : > { %p870_p2 = pnand %p869_p1, %p1013_p4  ;;  %p875_p7 = por %p874_p6, %p873_p5 }
  0x27   : > { %819 = vset.pattern.permute.xlu0 %v941_v3  ;;  %p871_p3 = pneg %p870_p2 }
  0x28   : > { %245 = vperm.xlu0 %819, %v235_v2  }
  0x29   : > { %p876_p9 = pnand %p875_p7, %p871_p3 }
  0x30   : > { %821 = vset.pattern.permute.xlu0 %v940_v1 }
  0x91   : > { %v240_v4 = vpop.permute.xlu0 %239  ;;  %v253_v13 = vpop.permute.xlu1 %252 }
  0x92   : > { %v243_v15 = vmul.f32 %v242_v10, %v240_v4  ;;  %v256_v17 = vmul.f32 %v255_v12, %v253_v13 }
  0x9a   : > { %v246_v14 = vpop.permute.xlu0 %245 }
  0x9b   : > { %v249_v16 = vmul.f32 %v248_v11, %v246_v14 }
  0x9d   : > { %v250_v18 = vadd.f32 %v249_v16, %v243_v15 }
  0x9f   : > { %v1046_v19 = vadd.f32 %v256_v17, %v250_v18 }
  0xa1   : > { %v261_v20 = vand.u32 2139095040, %v1046_v19  ;;  %v258_v23 = vand.u32 2147483647, %v1046_v19  ;;  %vm260_vm12 = vcmp.lt.s32.totalorder %v1046_v19, 0 }
  0xa3   : > { %v262_v21 = vshrl.u32 %v261_v20, 23  ;;  %v265_v25 = vand.u32 8388607, %v258_v23  ;;  %vm259_vm13 = vcmp.le.f32.partialorder %v258_v23, 0.7853982 }
  0xa5   : > { %v729_v22 = vadd.s32 4294967169, %v262_v21  ;;  %v266_v29 = vor.u32 8388608, %v265_v25 }
  0xa7   : > { %v268_v24 = vadd.s32 1, %v729_v22  ;;  %v1061_v50 = vshll.u32 %v266_v29, 8 }
  0xa9   : > { %vm269_vm0 = vcmp.gt.s32.totalorder %v268_v24, 0  ;;  %v307_v60 = vand.u32 65535, %v1061_v50  ;;  %v308_v62 = vshrl.u32 %v1061_v50, 16 }
  0xaa   : > { %v270_v26 = vsel %vm269_vm0, %v268_v24, 0 }
  0xab   : > { %v272_v27 = vand.u32 31, %v270_v26  ;;  %v1054_v30 = vshrl.u32 %v270_v26, 5 }
  0xad   : > { %v1052_v28 = vsub.s32 32, %v272_v27  ;;  %v284_v32 = vshll.u32 %v942_v31, %v272_v27  ;;  %v287_v34 = vshll.u32 %v943_v33, %v272_v27  ;;  %v275_v39 = vshll.u32 %v945_v38, %v272_v27 }
  0xae   : > { %v278_v42 = vshll.u32 %v946_v40, %v272_v27  ;;  %v281_v45 = vshll.u32 %v947_v43, %v272_v27  ;;  %vm293_vm1 = vcmp.lt.s32.totalorder %v1054_v30, 4  ;;  %vm290_vm2 = vcmp.lt.s32.totalorder %v1054_v30, 1 }
  0xaf   : > { %v285_v35 = vshrl.u32 %v943_v33, %v1052_v28  ;;  %v288_v37 = vshrl.u32 %v944_v36, %v1052_v28  ;;  %v276_v41 = vshrl.u32 %v946_v40, %v1052_v28  ;;  %v279_v44 = vshrl.u32 %v947_v43, %v1052_v28 }
  0xb0   : > { %v282_v46 = vshrl.u32 %v942_v31, %v1052_v28  ;;  %vm292_vm3 = vcmp.lt.s32.totalorder %v1054_v30, 3  ;;  %vm291_vm4 = vcmp.lt.s32.totalorder %v1054_v30, 2  ;;  %v274_v24 = vshrl.u32 %v945_v38, %v1052_v28 }
  0xb1   : > { %v286_v47 = vor.u32 %v285_v35, %v284_v32  ;;  %v289_v48 = vor.u32 %v288_v37, %v287_v34  ;;  %v277_v49 = vor.u32 %v276_v41, %v275_v39  ;;  %v280_v51 = vor.u32 %v279_v44, %v278_v42 }
  0xb2   : > { %v283_v52 = vor.u32 %v282_v46, %v281_v45 }
  0xb3   : > { %v299_v53 = vsel %vm293_vm1, %v286_v47, 920167782  ;;  %v303_v54 = vsel %vm293_vm1, %v289_v48, 1326507024  ;;  %v298_v55 = vsel %vm290_vm2, %v277_v49, %v280_v51  ;;  %v294_v32 = vsel %vm290_vm2, %v274_v24, %v277_v49 }
  0xb4   : > { %v300_v56 = vsel %vm292_vm3, %v283_v52, %v299_v53  ;;  %v302_v57 = vsel %vm290_vm2, %v280_v51, %v283_v52  ;;  %v304_v59 = vsel %vm292_vm3, %v286_v47, %v303_v54  ;;  %v295_v20 = vsel %vm293_vm1, %v283_v52, 2102212464 }
  0xb5   : > { %v301_v58 = vsel %vm291_vm4, %v298_v55, %v300_v56  ;;  %v305_v61 = vsel %vm291_vm4, %v302_v57, %v304_v59  ;;  %v296_v33 = vsel %vm292_vm3, %v280_v51, %v295_v20 }
  0xb6   : > { %v331_v63 = vand.u32 65535, %v301_v58  ;;  %v332_v1 = vshrl.u32 %v301_v58, 16  ;;  %v309_v2 = vand.u32 65535, %v305_v61  ;;  %v310_v3 = vshrl.u32 %v305_v61, 16 }
  0xb7   : > { %v297_v38 = vsel %vm291_vm4, %v294_v32, %v296_v33  ;;  %vm571_vm4 = vcmask 130048  }
  0xb8   : > { %v334_v4 = vmul.u32 %v332_v1, %v307_v60  ;;  %v335_v5 = vmul.u32 %v331_v63, %v308_v62  ;;  %v312_v6 = vmul.u32 %v310_v3, %v307_v60  ;;  %v313_v7 = vmul.u32 %v309_v2, %v308_v62 }
  0xb9   : > { %v333_v8 = vmul.u32 %v331_v63, %v307_v60  ;;  %v311_v10 = vmul.u32 %v309_v2, %v307_v60  ;;  %v336_v12 = vmul.u32 %v332_v1, %v308_v62  ;;  %v314_v13 = vmul.u32 %v310_v3, %v308_v62 }
  0xba   : > { %v337_v9 = vshll.u32 %v334_v4, 16  ;;  %v315_v11 = vshll.u32 %v312_v6, 16  ;;  %v339_v14 = vshll.u32 %v335_v5, 16  ;;  %v317_v16 = vshll.u32 %v313_v7, 16 }
  0xbb   : > { %v338_v29 = vshrl.u32 %v334_v4, 16  ;;  %v316_v34 = vshrl.u32 %v312_v6, 16  ;;  %v340_v36 = vshrl.u32 %v335_v5, 16  ;;  %v318_v39 = vshrl.u32 %v313_v7, 16 }
  0xbc   : > { %vm341_vm5 = vc.u32 %v333_v8, %v337_v9  ;;  %v343_v15 = vadd.s32 %v337_v9, %v333_v8  ;;  %vm319_vm6 = vc.u32 %v311_v10, %v315_v11  ;;  %v321_v17 = vadd.s32 %v315_v11, %v311_v10 }
  0xbd   : > { %v342_v18 = vsel %vm341_vm5, 1, %v939_v0  ;;  %v320_v21 = vsel %vm319_vm6, 1, %v939_v0  ;;  %v351_v43 = vmul.u32 %v1061_v50, %v297_v38  ;;  %vm401_vm5 = vweird.f32 %v1046_v19 }
  0xbe   : > { %v344_v22 = vadd.s32 %v342_v18, %v336_v12  ;;  %vm345_vm7 = vc.u32 %v343_v15, %v339_v14  ;;  %v322_v25 = vadd.s32 %v320_v21, %v314_v13  ;;  %vm323_vm8 = vc.u32 %v321_v17, %v317_v16 }
  0xbf   : > { %v346_v26 = vsel %vm345_vm7, 1, %v939_v0  ;;  %v324_v27 = vsel %vm323_vm8, 1, %v939_v0  ;;  %v347_v0 = vadd.s32 %v343_v15, %v339_v14  ;;  %vm618_vm6 = vcmask 523264  }
  0xc0   : > { %v348_v31 = vadd.s32 %v346_v26, %v344_v22  ;;  %v326_v35 = vadd.s32 %v324_v27, %v322_v25 }
  0xc2   : > { %v349_v37 = vadd.s32 %v348_v31, %v338_v29  ;;  %v327_v28 = vadd.s32 %v326_v35, %v316_v34 }
  0xc4   : > { %v350_v40 = vadd.s32 %v349_v37, %v340_v36  ;;  %v328_v41 = vadd.s32 %v327_v28, %v318_v39 }
  0xc6   : > { %v354_v42 = vadd.s32 1, %v350_v40  ;;  %vm353_vm9 = vc.u32 %v328_v41, %v347_v0  ;;  %v352_v55 = vadd.s32 %v347_v0, %v328_v41 }
  0xc8   : > { %v355_v44 = vsel %vm353_vm9, %v354_v42, %v350_v40 }
  0xc9   : > { %v356_v45 = vadd.s32 %v355_v44, %v351_v43 }
  0xcb   : > { %v357_v46 = vadd.s32 536870912, %v356_v45 }
  0xcd   : > { %v358_v47 = vshrl.u32 %v357_v46, 30 }
  0xcf   : > { %v359_v48 = vshll.u32 %v358_v47, 30  ;;  %v382_v5 = vsub.s32 4, %v358_v47 }
  0xd1   : > { %v360_v49 = vsub.s32 %v356_v45, %v359_v48  ;;  %v383_v10 = vsel %vm260_vm12, %v382_v5, %v358_v47 }
  0xd2   : > { %v385_v13 = vsel %vm259_vm13, 0, %v383_v10 }
  0xd3   : > { %vm361_vm10 = vcmp.lt.s32.totalorder %v360_v49, 0  ;;  %v362_v51 = vsub.s32 0, %v360_v49  ;;  %v556_v18 = vadd.s32 3, %v385_v13  ;;  %v402_v24 = vand.u32 3, %v385_v13 }
  0xd5   : > { %v363_v52 = vsel %vm361_vm10, %v362_v51, %v360_v49  ;;  %v557_v25 = vand.u32 3, %v556_v18  ;;  %vm403_vm14 = vcmp.lt.s32.totalorder %v402_v24, 2  ;;  %vm404_vm15 = vcmp.eq.s32.totalorder %v402_v24, 0 }
  0xd6   : > { %v364_v53 = vclz %v363_v52  ;;  %vm407_vm0 = vcmp.eq.s32.totalorder %v402_v24, 2 }
  0xd7   : > { %vm558_vm1 = vcmp.lt.s32.totalorder %v557_v25, 2  ;;  %vm559_vm2 = vcmp.eq.s32.totalorder %v557_v25, 0  ;;  %vm562_vm3 = vcmp.eq.s32.totalorder %v557_v25, 2 }
  0xd8   : > { %v730_v54 = vadd.s32 4294967294, %v364_v53 }
  0xda   : > { %vm731_vm11 = vcmp.lt.s32.totalorder %v730_v54, 0 }
  0xdb   : > { %v367_v30 = vsel %vm731_vm11, 0, %v730_v54 }
  0xdc   : > { %v368_v56 = vsub.s32 32, %v367_v30  ;;  %v372_v57 = vsub.s32 4294967266, %v367_v30  ;;  %v369_v58 = vshll.u32 %v360_v49, %v367_v30 }
  0xde   : > { %v370_v59 = vshrl.u32 %v352_v55, %v368_v56  ;;  %v373_v50 = vadd.s32 127, %v372_v57 }
  0xe0   : > { %v371_v60 = vor.u32 %v370_v59, %v369_v58  ;;  %v374_v61 = vshll.u32 %v373_v50, 23 }
  0xe2   : > { %v375_v62 = vor.u32 4788187, %v374_v61  ;;  %v378_v1 = vcvt.s32.f32 %v371_v60 }
  0xe4   : > { %v376_v63 = vand.u32 2147483647, %v375_v62 }
  0xe6   : > { %v379_v2 = vmul.f32 %v378_v1, %v376_v63 }
  0xe8   : > { %v380_v3 = vxor.u32 2147483648, %v379_v2 }
  0xea   : > { %v381_v4 = vsel %vm260_vm12, %v380_v3, %v379_v2 }
  0xeb   : > { %v384_v6 = vsel %vm259_vm13, %v1046_v19, %v381_v4 }
  0xec   : > { %v386_v7 = vmul.f32 %v384_v6, %v384_v6 }
  0xee   : > { %v387_v8 = vmul.f32 -0.001358992, %v386_v7  ;;  %v394_v9 = vmul.f32 -0.00019511016, %v386_v7 }
  0xf0   : > { %v388_v11 = vadd.f32 0.041655596, %v387_v8  ;;  %v395_v12 = vadd.f32 0.008332121, %v394_v9 }
  0xf2   : > { %v389_v14 = vmul.f32 %v388_v11, %v386_v7  ;;  %v396_v15 = vmul.f32 %v395_v12, %v386_v7 }
  0xf4   : > { %v390_v16 = vadd.f32 -0.4999988, %v389_v14  ;;  %v397_v17 = vadd.f32 -0.16666654, %v396_v15 }
  0xf6   : > { %v391_v20 = vmul.f32 %v390_v16, %v386_v7  ;;  %v398_v21 = vmul.f32 %v397_v17, %v386_v7 }
  0xf8   : > { %v392_v22 = vadd.f32 1.0, %v391_v20  ;;  %v399_v23 = vadd.f32 1.0, %v398_v21 }
  0xfa   : > { %v400_v26 = vmul.f32 %v399_v23, %v384_v6  ;;  %v408_v27 = vxor.u32 2147483648, %v392_v22 }
  0xfc   : > { %v405_v29 = vxor.u32 2147483648, %v400_v26  ;;  %v564_v32 = vsel %vm562_vm3, %v408_v27, %v400_v26  ;;  %v409_v34 = vsel %vm407_vm0, %v408_v27, %v400_v26 }
  0xfe   : > { %v561_v31 = vsel %vm559_vm2, %v392_v22, %v405_v29  ;;  %v406_v33 = vsel %vm404_vm15, %v392_v22, %v405_v29 }
  0xff   : > { %v565_v35 = vsel %vm558_vm1, %v561_v31, %v564_v32  ;;  %v410_v36 = vsel %vm403_vm14, %v406_v33, %v409_v34 }
 0x100   : > { %v566_v37 = vsel %vm401_vm5, nan, %v565_v35  ;;  %v411_v39 = vsel %vm401_vm5, nan, %v410_v36 }
 0x101   : > { %735 = vmatmul.msk.f32.vlgmr.msra.gmra.mxu0 %vm571_vm4, %v566_v37  ;;  %736 = vmatmul.msk.f32.vlgmr.msra.gmra.mxu1 %vm571_vm4, %v411_v39 }
 0x17e   : > { %v592_v28 = vpop.f32.mrf.mxu0  ;;  %v615_v38 = vpop.f32.mrf.mxu1 }
 0x17f   : > { %v616_v19 = vadd.f32 %v615_v38, %v592_v28 }
 0x181   : > { %619 = vst.msk [vmem:[%s227_s11] sm:$0xff] %vm618_vm6, %v616_v19 }
 0x182   : > { %879 = shalt.err (!%p876_p9)
}
 0x183   : > { %745 = dma.vmem_to_hbm [thread:$0]  (%p1013_p4), %s635_s12, 128, %s637_s13, %s621_s14  }
 0x184 PF: > { %p757_p10 = scmp.ge.s32.totalorder %s934_s20, 2  ;;  %s648_s5 = sand.u32 1, %s914_s15  }
 0x185   : > { %s649_s6 = scalar_lea.sflag [#allocation4], %s648_s5 }
 0x186   : > { %p752_p11 = pnand %p757_p10, %p1020_p8 }
 0x188   : > { %p753_p12 = pneg %p752_p11 }
 0x18a   : > { %909 = dma.done.wait (%p753_p12), %s649_s6, 128  }
 0x18b   : > { %911 = vsyncadd (%p753_p12), %s649_s6, 4294967168  ;;  %s18_s20 = sadd.s32 1, %s934_s20   ;;  %s1148_s15 = smov %s918_s16 }
 0x18c   : > { %p15_p13 = scmp.ge.s32.totalorder %s18_s20, 4   ;;  %s1149_s16 = smov %s922_s17 }
 0x18d   : > { %s1150_s17 = smov %s1026_s28  ;;  %s1151_s18 = smov %s930_s19 }
 0x18e   : > { %s1152_s19 = smov %s1154_s23  ;;  %17 = sbr.rel (!%p15_p13) target bundleno = 5 (0x5), region = 76 }
 0x193   :  { %655 = vsyncpa [#allocation3], 1 }
 0x194   :  { %657 = vsyncpa [#allocation3 + $0x1], 1 }
 0x195   :  { %658 = vsyncpa [#allocation4], 1 }
 0x196   :  { %660 = vsyncpa [#allocation4 + $0x1], 1 }

</bundles_post_ra>
